<compile_context>
chip_gen: v7x
topology: tpu7x:2x2x1
jax: 0.10.0
libtpu: 0.0.40
codegen_flags: <defaults>
</compile_context>

<pallas_src>
import jax
import jax.numpy as jnp
from jax.experimental import pallas as pl
from jax.experimental.pallas import tpu as pltpu


def _round_up(x, m):
    return ((x + m - 1) // m) * m


def mlp_softmax_kernel(x_ref, w1_ref, b1_ref, w2_ref, b2_ref, w3_ref, b3_ref, out_ref):
    x = x_ref[...]                                                       # (tb, S)

    # Linear(S,128) + ReLU
    h1 = jnp.dot(x, w1_ref[...], preferred_element_type=jnp.float32) + b1_ref[...]
    h1 = jnp.maximum(h1, 0.0)

    # Linear(128,64) + ReLU
    h2 = jnp.dot(h1, w2_ref[...], preferred_element_type=jnp.float32) + b2_ref[...]
    h2 = jnp.maximum(h2, 0.0)

    # Linear(64, A_pad): padded columns have zero weights and -1e30 bias, so after
    # the max-subtraction their exp underflows to exactly 0 -> softmax over the
    # real A actions is unchanged.
    logits = jnp.dot(h2, w3_ref[...], preferred_element_type=jnp.float32) + b3_ref[...]

    m = jnp.max(logits, axis=-1, keepdims=True)
    e = jnp.exp(logits - m)
    denom = jnp.sum(e, axis=-1, keepdims=True)
    probs = e / denom                                                    # exact division

    # Store only the real action columns: (tb, A) block, 16x less HBM write than
    # a 128-lane padded store, and no wrapper slice kernel afterwards.
    out_ref[...] = probs[:, : out_ref.shape[-1]].astype(out_ref.dtype)


def _default_min_parallel():
    """v7x has 2 TensorCores per chip -> want >=2 'parallel' grid steps; on
    single-TC v5e/v6e one big tile avoids an extra grid-step overhead."""
    try:
        kind = jax.devices()[0].device_kind.lower()
    except Exception:
        return 1
    return 2 if "v7" in kind else 1


def _pick_batch_tile(B, *, target_tb=1024, min_parallel=1):
    """Balanced batch tile: split B into n_tiles roughly-equal tiles (multiple of 8),
    n_tiles >= min_parallel, each tile <= ~target_tb."""
    n_tiles = max(pl.cdiv(B, target_tb), min_parallel, 1)
    return max(8, _round_up(pl.cdiv(B, n_tiles), 8))


def prepare_policy_params(params):
    """One-time preprocessing (do NOT call per step): pad the final layer to a
    lane-dense 128-multiple width with zero weights and -1e30 bias."""
    w1, b1, w2, b2, w3, b3 = params
    H2, A = w3.shape
    A_pad = max(128, _round_up(A, 128))
    w3p = jnp.zeros((H2, A_pad), w3.dtype).at[:, :A].set(w3)
    b3p = jnp.full((1, A_pad), -1e30, b3.dtype).at[:, :A].set(b3)
    return (w1, b1, w2, b2, w3p, b3p, A)


def policy_forward(x, prepared_params, *, tb=None, min_parallel=None):
    """Fused policy MLP + softmax as a single Pallas TPU kernel.

    x: (B, S) float32.  prepared_params: output of prepare_policy_params.
    Returns categorical probabilities (B, A) float32.
    """
    w1, b1, w2, b2, w3p, b3p, A = prepared_params
    B, S = x.shape
    H1 = w1.shape[1]
    H2 = w2.shape[1]
    A_pad = w3p.shape[1]

    if min_parallel is None:
        min_parallel = _default_min_parallel()
    if tb is None:
        tb = _pick_batch_tile(B, min_parallel=min_parallel)
    tb = max(8, _round_up(int(tb), 8))

    # Ragged batches: no jnp.pad of x -- Pallas clamps the tail block's DMA and
    # discards out-of-bounds output rows.
    grid = (pl.cdiv(B, tb),)

    weight_bytes = (S * H1 + H1 + H1 * H2 + H2 + H2 * A_pad + A_pad) * 4
    cost = pl.CostEstimate(
        flops=2 * B * (S * H1 + H1 * H2 + H2 * A_pad),
        transcendentals=B * A_pad,
        bytes_accessed=B * (S + A) * 4 + weight_bytes,
    )

    out = pl.pallas_call(
        mlp_softmax_kernel,
        out_shape=jax.ShapeDtypeStruct((B, A), jnp.float32),
        grid=grid,
        in_specs=[
            pl.BlockSpec((tb, S), lambda i: (i, 0)),       # x   tiled over batch
            pl.BlockSpec((S, H1), lambda i: (0, 0)),       # W1  (grid-invariant)
            pl.BlockSpec((1, H1), lambda i: (0, 0)),       # b1
            pl.BlockSpec((H1, H2), lambda i: (0, 0)),      # W2
            pl.BlockSpec((1, H2), lambda i: (0, 0)),       # b2
            pl.BlockSpec((H2, A_pad), lambda i: (0, 0)),   # W3 (lane-dense padded)
            pl.BlockSpec((1, A_pad), lambda i: (0, 0)),    # b3 (padded with -1e30)
        ],
        out_specs=pl.BlockSpec((tb, A), lambda i: (i, 0)),  # direct (B, A) store
        compiler_params=pltpu.CompilerParams(
            dimension_semantics=("parallel",)),
        cost_estimate=cost,
    )(x, w1, b1, w2, b2, w3p, b3p)

    return out


def init_params(key, state_dim, action_dims):
    """Deterministic init mimicking torch.nn.Linear default U(-1/sqrt(fan_in), ...)."""
    dims = [(state_dim, 128), (128, 64), (64, action_dims)]
    params = []
    for fan_in, fan_out in dims:
        key, kw, kb = jax.random.split(key, 3)
        bound = 1.0 / jnp.sqrt(float(fan_in))
        # stored transposed: (in, out)
        w = jax.random.uniform(kw, (fan_in, fan_out), jnp.float32, -bound, bound)
        b = jax.random.uniform(kb, (1, fan_out), jnp.float32, -bound, bound)
        params += [w, b]
    return tuple(params)


def reference_forward(x, params):
    w1, b1, w2, b2, w3, b3 = params
    h1 = jnp.maximum(x @ w1 + b1, 0.0)
    h2 = jnp.maximum(h1 @ w2 + b2, 0.0)
    logits = h2 @ w3 + b3
    return jax.nn.softmax(logits, axis=-1)


if __name__ == "__main__":
    # Small, deterministic shapes: batch=8, state_dim=16, action_dims=8.
    B, S, A = 8, 16, 8
    key = jax.random.PRNGKey(0)
    key, kx = jax.random.split(key)
    x = jax.random.normal(kx, (B, S), jnp.float32)
    params = init_params(key, S, A)
    prepared = prepare_policy_params(params)   # one-time padding of W3/b3

    probs = jax.block_until_ready(policy_forward(x, prepared))
    ref = reference_forward(x, params)
    assert probs.shape == (B, A)
    assert jnp.allclose(probs, ref, atol=1e-5, rtol=1e-5)
    assert jnp.allclose(jnp.sum(probs, axis=-1), 1.0, atol=1e-5)

    # Exercise the ragged-batch path (non-divisible grid tail block, no x padding).
    B2 = 300
    key, kx2 = jax.random.split(key)
    x2 = jax.random.normal(kx2, (B2, S), jnp.float32)
    probs2 = jax.block_until_ready(policy_forward(x2, prepared))
    ref2 = reference_forward(x2, params)
    assert probs2.shape == (B2, A)
    assert jnp.allclose(probs2, ref2, atol=1e-5, rtol=1e-5)
    assert jnp.allclose(jnp.sum(probs2, axis=-1), 1.0, atol=1e-5)

    # TODO(synk): torch.distributions.Categorical (sampling / log_prob object)
    # has no Pallas equivalent; the kernel returns the categorical probabilities.
    print("KERNEL_OK")
</pallas_src>

<mosaic_0001>
module attributes {stable_mosaic.version = 11 : i64} {
  func.func @mlp_softmax_kernel(%arg0: i32, %arg1: memref<8x16xf32, #tpu.memory_space<vmem>>, %arg2: memref<16x128xf32, #tpu.memory_space<vmem>>, %arg3: memref<1x128xf32, #tpu.memory_space<vmem>>, %arg4: memref<128x64xf32, #tpu.memory_space<vmem>>, %arg5: memref<1x64xf32, #tpu.memory_space<vmem>>, %arg6: memref<64x128xf32, #tpu.memory_space<vmem>>, %arg7: memref<1x128xf32, #tpu.memory_space<vmem>>, %arg8: memref<8x8xf32, #tpu.memory_space<vmem>>) attributes {dimension_semantics = [#tpu.dimension_semantics<parallel>], iteration_bounds = array<i64: 1>, scalar_prefetch = 0 : i64, scratch_operands = 0 : i64, tpu.core_type = #tpu.core_type<tc>, window_params = [{transform_indices = @transform_0, window_bounds = array<i64: 8, 16>}, {pipeline_mode = #tpu.pipeline_mode<synchronous>, transform_indices = @transform_1, window_bounds = array<i64: 16, 128>}, {pipeline_mode = #tpu.pipeline_mode<synchronous>, transform_indices = @transform_2, window_bounds = array<i64: 1, 128>}, {pipeline_mode = #tpu.pipeline_mode<synchronous>, transform_indices = @transform_3, window_bounds = array<i64: 128, 64>}, {pipeline_mode = #tpu.pipeline_mode<synchronous>, transform_indices = @transform_4, window_bounds = array<i64: 1, 64>}, {pipeline_mode = #tpu.pipeline_mode<synchronous>, transform_indices = @transform_5, window_bounds = array<i64: 64, 128>}, {pipeline_mode = #tpu.pipeline_mode<synchronous>, transform_indices = @transform_6, window_bounds = array<i64: 1, 128>}, {transform_indices = @transform_7, window_bounds = array<i64: 8, 8>}]} {
    %c0 = arith.constant 0 : index
    %c0_0 = arith.constant 0 : index
    %0 = vector.load %arg1[%c0, %c0_0] : memref<8x16xf32, #tpu.memory_space<vmem>>, vector<8x16xf32>
    %c0_1 = arith.constant 0 : index
    %c0_2 = arith.constant 0 : index
    %1 = vector.load %arg2[%c0_1, %c0_2] : memref<16x128xf32, #tpu.memory_space<vmem>>, vector<16x128xf32>
    %cst = arith.constant dense<0.000000e+00> : vector<8x128xf32>
    %2 = tpu.matmul %0, %1, %cst {dimension_numbers = #tpu.dot_dimension_numbers<[1], [0], [0], [1], [0, 0, 1, 1], [], []>} : vector<8x16xf32>, vector<16x128xf32>, vector<8x128xf32> -> vector<8x128xf32>
    %c0_3 = arith.constant 0 : index
    %c0_4 = arith.constant 0 : index
    %3 = vector.load %arg3[%c0_3, %c0_4] : memref<1x128xf32, #tpu.memory_space<vmem>>, vector<1x128xf32>
    %4 = vector.broadcast %3 : vector<1x128xf32> to vector<8x128xf32>
    %5 = arith.addf %2, %4 : vector<8x128xf32>
    %cst_5 = arith.constant 0.000000e+00 : f32
    %6 = vector.broadcast %cst_5 : f32 to vector<8x128xf32>
    %7 = arith.maximumf %5, %6 : vector<8x128xf32>
    %c0_6 = arith.constant 0 : index
    %c0_7 = arith.constant 0 : index
    %8 = vector.load %arg4[%c0_6, %c0_7] : memref<128x64xf32, #tpu.memory_space<vmem>>, vector<128x64xf32>
    %cst_8 = arith.constant dense<0.000000e+00> : vector<8x64xf32>
    %9 = tpu.matmul %7, %8, %cst_8 {dimension_numbers = #tpu.dot_dimension_numbers<[1], [0], [0], [1], [0, 0, 1, 1], [], []>} : vector<8x128xf32>, vector<128x64xf32>, vector<8x64xf32> -> vector<8x64xf32>
    %c0_9 = arith.constant 0 : index
    %c0_10 = arith.constant 0 : index
    %10 = vector.load %arg5[%c0_9, %c0_10] : memref<1x64xf32, #tpu.memory_space<vmem>>, vector<1x64xf32>
    %11 = vector.broadcast %10 : vector<1x64xf32> to vector<8x64xf32>
    %12 = arith.addf %9, %11 : vector<8x64xf32>
    %cst_11 = arith.constant 0.000000e+00 : f32
    %13 = vector.broadcast %cst_11 : f32 to vector<8x64xf32>
    %14 = arith.maximumf %12, %13 : vector<8x64xf32>
    %c0_12 = arith.constant 0 : index
    %c0_13 = arith.constant 0 : index
    %15 = vector.load %arg6[%c0_12, %c0_13] : memref<64x128xf32, #tpu.memory_space<vmem>>, vector<64x128xf32>
    %cst_14 = arith.constant dense<0.000000e+00> : vector<8x128xf32>
    %16 = tpu.matmul %14, %15, %cst_14 {dimension_numbers = #tpu.dot_dimension_numbers<[1], [0], [0], [1], [0, 0, 1, 1], [], []>} : vector<8x64xf32>, vector<64x128xf32>, vector<8x128xf32> -> vector<8x128xf32>
    %c0_15 = arith.constant 0 : index
    %c0_16 = arith.constant 0 : index
    %17 = vector.load %arg7[%c0_15, %c0_16] : memref<1x128xf32, #tpu.memory_space<vmem>>, vector<1x128xf32>
    %18 = vector.broadcast %17 : vector<1x128xf32> to vector<8x128xf32>
    %19 = arith.addf %16, %18 : vector<8x128xf32>
    %cst_17 = arith.constant dense<0xFF800000> : vector<8xf32>
    %20 = vector.multi_reduction <maximumf>, %19, %cst_17 [1] : vector<8x128xf32> to vector<8xf32>
    %21 = vector.shape_cast %20 : vector<8xf32> to vector<8x1xf32>
    %22 = vector.broadcast %21 : vector<8x1xf32> to vector<8x128xf32>
    %23 = arith.subf %19, %22 : vector<8x128xf32>
    %24 = math.exp %23 : vector<8x128xf32>
    %cst_18 = arith.constant dense<0.000000e+00> : vector<8xf32>
    %25 = vector.multi_reduction <add>, %24, %cst_18 [1] : vector<8x128xf32> to vector<8xf32>
    %26 = vector.shape_cast %25 : vector<8xf32> to vector<8x1xf32>
    %27 = vector.broadcast %26 : vector<8x1xf32> to vector<8x128xf32>
    %28 = arith.divf %24, %27 : vector<8x128xf32>
    %29 = vector.extract_strided_slice %28 {offsets = [0, 0], sizes = [8, 8], strides = [1, 1]} : vector<8x128xf32> to vector<8x8xf32>
    %c0_19 = arith.constant 0 : index
    %c0_20 = arith.constant 0 : index
    %30 = vector.load %arg8[%c0_19, %c0_20] : memref<8x8xf32, #tpu.memory_space<vmem>>, vector<8x8xf32>
    tpu.vector_store %arg8[%c0_19, %c0_20], %29 {strides = array<i32>} : memref<8x8xf32, #tpu.memory_space<vmem>>, vector<8x8xf32>,
    return
  }
  func.func @transform_0(%arg0: i32) -> (i32, i32) {
    %c0_i32 = arith.constant 0 : i32
    %c0_i32_0 = arith.constant 0 : i32
    return %arg0, %c0_i32 : i32, i32
  }
  func.func @transform_1(%arg0: i32) -> (i32, i32) {
    %c0_i32 = arith.constant 0 : i32
    %c0_i32_0 = arith.constant 0 : i32
    %c0_i32_1 = arith.constant 0 : i32
    return %c0_i32, %c0_i32_0 : i32, i32
  }
  func.func @transform_2(%arg0: i32) -> (i32, i32) {
    %c0_i32 = arith.constant 0 : i32
    %c0_i32_0 = arith.constant 0 : i32
    %c0_i32_1 = arith.constant 0 : i32
    return %c0_i32, %c0_i32_0 : i32, i32
  }
  func.func @transform_3(%arg0: i32) -> (i32, i32) {
    %c0_i32 = arith.constant 0 : i32
    %c0_i32_0 = arith.constant 0 : i32
    %c0_i32_1 = arith.constant 0 : i32
    return %c0_i32, %c0_i32_0 : i32, i32
  }
  func.func @transform_4(%arg0: i32) -> (i32, i32) {
    %c0_i32 = arith.constant 0 : i32
    %c0_i32_0 = arith.constant 0 : i32
    %c0_i32_1 = arith.constant 0 : i32
    return %c0_i32, %c0_i32_0 : i32, i32
  }
  func.func @transform_5(%arg0: i32) -> (i32, i32) {
    %c0_i32 = arith.constant 0 : i32
    %c0_i32_0 = arith.constant 0 : i32
    %c0_i32_1 = arith.constant 0 : i32
    return %c0_i32, %c0_i32_0 : i32, i32
  }
  func.func @transform_6(%arg0: i32) -> (i32, i32) {
    %c0_i32 = arith.constant 0 : i32
    %c0_i32_0 = arith.constant 0 : i32
    %c0_i32_1 = arith.constant 0 : i32
    return %c0_i32, %c0_i32_0 : i32, i32
  }
  func.func @transform_7(%arg0: i32) -> (i32, i32) {
    %c0_i32 = arith.constant 0 : i32
    %c0_i32_0 = arith.constant 0 : i32
    return %arg0, %c0_i32 : i32, i32
  }
}

</mosaic_0001>

<bundles_post_ra>
// kernel: tpu_custom_call.1
= control target key start
LH: loop header
LB: loop body
LE: loop exit
PB: predicated region body
PF: predicated region fallthrough
CT: control target
= control target key end

     0   :  { %v486_v2 = vmov 0.0|0.0   ;;  %vm487_vm0 = vmmov 0   ;;  %v488_v4 = vmov 0.0   ;;  %vm37_vm1 = vcmask 130048   ;;  %s648_s0 = inlined_call_operand.vmem [shape: f32[8,16], index: 0, kind: input, shape index: {}]   ;;  %s649_s1 = inlined_call_operand.vmem [shape: f32[16,128], index: 1, kind: input, shape index: {}]   ;;  %s650_s2 = inlined_call_operand.vmem [shape: f32[1,128], index: 2, kind: input, shape index: {}]   ;;  %s651_s3 = inlined_call_operand.vmem [shape: f32[128,64], index: 3, kind: input, shape index: {}]   ;;  %s652_s4 = inlined_call_operand.vmem [shape: f32[1,64], index: 4, kind: input, shape index: {}]   ;;  %s653_s5 = inlined_call_operand.vmem [shape: f32[64,128], index: 5, kind: input, shape index: {}]   ;;  %s654_s6 = inlined_call_operand.vmem [shape: f32[1,128], index: 6, kind: input, shape index: {}]   ;;  %s655_s7 = inlined_call_operand.hbm [shape: f32[8,8], index: 7, kind: output, shape index: {}]  }
   0x1   :  { %v28_v0 = vld [vmem:[%s649_s1] sm:$0xff]  ;;  %v29_v1 = vld [vmem:[%s649_s1 + $0x8] sm:$0xff]  ;;  %415 = vmatprep.subr.bf16.mxu0 %v486_v2  ;;  %358 = vmatprep.mubr.msk.f32.mxu0 %vm487_vm0, %v488_v4  ;;  %v114_v7 = vld [vmem:[%s651_s3 + $0x10] sm:$0xff] }
   0x2   :  { %v416_v3 = vpack.c.bf16 %v29_v1, %v28_v0  ;;  %v112_v5 = vld [vmem:[%s651_s3] sm:$0xff]  ;;  %v113_v6 = vld [vmem:[%s651_s3 + $0x8] sm:$0xff]  ;;  %418 = vmatprep.subr.bf16.mxu1 %v486_v2  ;;  %v115_v9 = vld [vmem:[%s651_s3 + $0x18] sm:$0xff]  ;;  %393 = vmatprep.mubr.msk.f32.mxu1 %vm487_vm0, %v488_v4 }
   0x3   :  { %v419_v8 = vpack.c.bf16 %v113_v6, %v112_v5  ;;  %v27_v10 = vld [vmem:[%s648_s0] sm:$0xff]  ;;  %v422_v11 = vpack.c.bf16 %v115_v9, %v114_v7  ;;  %v117_v13 = vld [vmem:[%s651_s3 + $0x28] sm:$0xff] }
   0x4   :  { %417 = vmatpush3.bf16.msra.mxu0 %v416_v3  ;;  %v116_v12 = vld [vmem:[%s651_s3 + $0x20] sm:$0xff] }
   0x5   :  { %420 = vmatpush3.bf16.msra.mxu1 %v419_v8  ;;  %442 = vmatprep.subr.bf16.mxu0 %v486_v2 }
   0x6   :  { %421 = vmatprep.subr.bf16.mxu1 %v486_v2 }
   0x7   :  { %359 = vmatmul.mubr.msk.f32.vlgmr.msra.gmra.mrb[0].mxu0 %vm37_vm1, %v27_v10 }
   0x8   :  { %12 = vsyncpa [#allocation3], 0  ;;  %412 = vmatprep.mubr.msk.f32.mxu0 %vm487_vm0, %v488_v4  ;;  %v425_v14 = vpack.c.bf16 %v117_v13, %v116_v12  ;;  %v118_v15 = vld [vmem:[%s651_s3 + $0x30] sm:$0xff]  ;;  %v119_v16 = vld [vmem:[%s651_s3 + $0x38] sm:$0xff]  ;;  %vm221_vm2 = vcmask 523264   ;;  %vm304_vm3 = vcmask 64512  }
   0x9   :  { %423 = vmatpush3.bf16.msra.mxu1 %v422_v11  ;;  %v428_v17 = vpack.c.bf16 %v119_v16, %v118_v15  ;;  %v120_v18 = vld [vmem:[%s651_s3 + $0x40] sm:$0xff]  ;;  %v121_v19 = vld [vmem:[%s651_s3 + $0x48] sm:$0xff]  ;;  %v122_v21 = vld [vmem:[%s651_s3 + $0x50] sm:$0xff] }
   0xa   :  { %424 = vmatprep.subr.bf16.mxu1 %v486_v2  ;;  %v431_v20 = vpack.c.bf16 %v121_v19, %v120_v18  ;;  %v123_v22 = vld [vmem:[%s651_s3 + $0x58] sm:$0xff]  ;;  %v124_v24 = vld [vmem:[%s651_s3 + $0x60] sm:$0xff]  ;;  %v125_v25 = vld [vmem:[%s651_s3 + $0x68] sm:$0xff] }
   0xb   :  { %v434_v23 = vpack.c.bf16 %v123_v22, %v122_v21  ;;  %v437_v26 = vpack.c.bf16 %v125_v25, %v124_v24  ;;  %v126_v27 = vld [vmem:[%s651_s3 + $0x70] sm:$0xff]  ;;  %v127_v28 = vld [vmem:[%s651_s3 + $0x78] sm:$0xff]  ;;  %v206_v30 = vld [vmem:[%s653_s5] sm:$0xff] }
   0xc   :  { %v440_v29 = vpack.c.bf16 %v127_v28, %v126_v27  ;;  %v207_v31 = vld [vmem:[%s653_s5 + $0x8] sm:$0xff]  ;;  %v208_v32 = vld [vmem:[%s653_s5 + $0x10] sm:$0xff]  ;;  %v209_v34 = vld [vmem:[%s653_s5 + $0x18] sm:$0xff] }
   0xd   :  { %426 = vmatpush3.bf16.msra.mxu1 %v425_v14  ;;  %v443_v33 = vpack.c.bf16 %v207_v31, %v206_v30  ;;  %v446_v35 = vpack.c.bf16 %v209_v34, %v208_v32  ;;  %v210_v36 = vld [vmem:[%s653_s5 + $0x20] sm:$0xff]  ;;  %v211_v37 = vld [vmem:[%s653_s5 + $0x28] sm:$0xff]  ;;  %v212_v44 = vld [vmem:[%s653_s5 + $0x30] sm:$0xff] }
   0xe   :  { %427 = vmatprep.subr.bf16.mxu1 %v486_v2  ;;  %v449_v38 = vpack.c.bf16 %v211_v37, %v210_v36  ;;  %v320_v39 = vld [vmem:[%s650_s2] ss:$0 sm:$0xff]  ;;  %v213_v45 = vld [vmem:[%s653_s5 + $0x38] sm:$0xff] }
   0xf   :  { %444 = vmatpush3.bf16.msra.mxu0 %v443_v33  ;;  %v452_v46 = vpack.c.bf16 %v213_v45, %v212_v44  ;;  %v322_v47 = vld [vmem:[%s652_s4] ss:$0 sm:$0xff]  ;;  %s489_s4 = smov [#allocation2]  }
  0x10   :  { %445 = vmatprep.subr.bf16.mxu0 %v486_v2  ;;  %v323_v52 = vld [vmem:[%s654_s6] ss:$0 sm:$0xff]  ;;  %s312_s5 = sshll.u32 %s489_s4, 4  ;;  %s313_s5 = int_to_ptr.vmem [resolvable:$true] %s312_s5 }
  0x11   :  { %429 = vmatpush3.bf16.msra.mxu1 %v428_v17  ;;  %s462_s6 = scalar_lea.vmem %s313_s5, 128  ;;  %p467_p1 = scmp.lt.s32.totalorder %s313_s5, %s313_s5 }
  0x12   :  { %430 = vmatprep.subr.bf16.mxu1 %v486_v2  ;;  %p463_p0 = scmp.ne.s32.totalorder %s313_s5, %s462_s6  ;;  %p468_p2 = scmp.lt.s32.totalorder %s462_s6, %s462_s6 }
  0x13   :  { %447 = vmatpush3.bf16.msra.mxu0 %v446_v35 }
  0x14   :  { %448 = vmatprep.subr.bf16.mxu0 %v486_v2  ;;  %p469_p3 = por %p468_p2, %p467_p1 }
  0x15   :  { %432 = vmatpush3.bf16.msra.mxu1 %v431_v20 }
  0x16   :  { %433 = vmatprep.subr.bf16.mxu1 %v486_v2  ;;  %p470_p4 = pnand %p469_p3, %p463_p0 }
  0x17   :  { %450 = vmatpush3.bf16.msra.mxu0 %v449_v38 }
  0x18   :  { %451 = vmatprep.subr.bf16.mxu0 %v486_v2 }
  0x19   :  { %435 = vmatpush3.bf16.msra.mxu1 %v434_v23 }
  0x1a   :  { %436 = vmatprep.subr.bf16.mxu1 %v486_v2 }
  0x1b   :  { %453 = vmatpush3.bf16.msra.mxu0 %v452_v46 }
  0x1d   :  { %438 = vmatpush3.bf16.msra.mxu1 %v437_v26 }
  0x1e   :  { %439 = vmatprep.subr.bf16.mxu1 %v486_v2 }
  0x21   :  { %441 = vmatpush3.bf16.msra.mxu1 %v440_v29 }
  0xda   :  { %v107_v40 = vpop.f32.mrb[0].mxu0 }
  0xdb   :  { %v108_v41 = vadd.f32 %v320_v39, %v107_v40  ;;  %v360_v42 = vpop.f32.mrb[1].mxu0 }
  0xdd   :  { %v111_v43 = vmax.f32 %v108_v41, 0.0 }
  0xdf   :  { %394 = vmatmul.mubr.f32.vlgmr.msra.gmra.mrb[0].mxu1 %v111_v43 }
 0x1b2   :  { %v201_v48 = vpop.f32.mrb[0].mxu1 }
 0x1b3   :  { %v202_v49 = vadd.f32 %v322_v47, %v201_v48  ;;  %v395_v50 = vpop.f32.mrb[1].mxu1 }
 0x1b5   :  { %v205_v51 = vmax.f32 %v202_v49, 0.0 }
 0x1b7   :  { %413 = vmatmul.mubr.msk.f32.vlgmr.msra.gmra.mrb[2].mxu0 %vm221_vm2, %v205_v51 }
 0x28a   :  { %v291_v53 = vpop.f32.mrb[2].mxu0 }
 0x28b   :  { %v292_v54 = vadd.f32 %v323_v52, %v291_v53  ;;  %v414_v55 = vpop.f32.mrb[3].mxu0 }
 0x28d   :  { %295 = vmax.xlane.f32.xlu0 %v292_v54 }
 0x31a   :  { %v296_v56 = vpop.xlane.xlu0 %295 }
 0x31b   :  { %v297_v57 = vsub.f32 %v292_v54, %v296_v56 }
 0x31d   :  { %v298_v58 = vmul.f32 1.442695, %v297_v57 }
 0x31f   :  { %458 = vpow2.f32 %v298_v58 }
 0x329   :  { %v459_v59 = vpop.eup %458 }
 0x32a   :  { %300 = vadd.xlane.f32.xlu0 %v459_v59 }
 0x3b7   :  { %v301_v60 = vpop.xlane.xlu0 %300 }
 0x3b8   :  { %460 = vrcp.f32 %v301_v60 }
 0x3c2   :  { %v461_v61 = vpop.eup %460 }
 0x3c3   :  { %v303_v62 = vmul.f32 %v461_v61, %v459_v59 }
 0x3c5   :  { %305 = vst.msk [vmem:[#allocation2] sm:$0xff] %vm304_vm3, %v303_v62 }
 0x3c6   :  { %473 = shalt.err (!%p470_p4)
}
 0x3c7   :  { %s474_s1 = scalar_lea.hbm %s655_s7, 128 }
 0x3c8   :  { %p475_p5 = scmp.ne.s32.totalorder %s655_s7, %s474_s1  ;;  %p478_p6 = scmp.lt.u32.totalorder %s474_s1, %s655_s7 }
 0x3ca   :  { %p480_p7 = pnand %p478_p6, %p475_p5 }
 0x3cc   :  { %483 = shalt.err (!%p480_p7)
}
 0x3cd   :  { %315 = dma.vmem_to_hbm [thread:$0]  %s313_s5, 128, %s655_s7, [#allocation3]  }
 0x3ce   :  { %484 = dma.done.wait [#allocation3], 128  }
 0x3cf   :  { %485 = vsyncadd [#allocation3], 4294967168 }
 0x3d0   :  { %319 = vsyncpa [#allocation3], 1 }

</bundles_post_ra>
